<compile_context>
chip_gen: v7x
topology: tpu7x:2x2x1
jax: 0.10.0
libtpu: 0.0.40
codegen_flags: <defaults>
</compile_context>

<pallas_src>
import functools

import jax
import jax.numpy as jnp
from jax.experimental import pallas as pl
from jax.experimental.pallas import tpu as pltpu


# ---------------------------------------------------------------------------
# Kernel bodies
# ---------------------------------------------------------------------------
def _mlp_logits(x, w1, b1, w2, b2, w3, b3, compute_dtype):
    """3-layer MLP. MXU accumulates in f32; bias/ReLU math stays f32.

    Optional low-precision cast happens here (in-kernel VPU cast on the resident
    tile), not in the wrapper, so no extra HBM round-trip is introduced.
    """
    if compute_dtype is not None:
        x = x.astype(compute_dtype)
        w1 = w1.astype(compute_dtype)
        w2 = w2.astype(compute_dtype)
        w3 = w3.astype(compute_dtype)
    h = jnp.dot(x, w1, preferred_element_type=jnp.float32) + b1
    h = jnp.maximum(h, 0.0)
    h = jnp.dot(h.astype(w2.dtype), w2, preferred_element_type=jnp.float32) + b2
    h = jnp.maximum(h, 0.0)
    return jnp.dot(h.astype(w3.dtype), w3, preferred_element_type=jnp.float32) + b3


def _stable_softmax(logits):
    m = jnp.max(logits, axis=-1, keepdims=True)
    e = jnp.exp(logits - m)
    return e / jnp.sum(e, axis=-1, keepdims=True)   # exact: rows sum to 1


def _policy_kernel(x_ref, w1, b1, w2, b2, w3, b3, o_ref, *, compute_dtype):
    logits = _mlp_logits(x_ref[...], w1[...], b1[...], w2[...], b2[...],
                         w3[...], b3[...], compute_dtype)
    o_ref[...] = _stable_softmax(logits).astype(o_ref.dtype)


def _value_kernel(x_ref, w1, b1, w2, b2, w3, b3, o_ref, *, compute_dtype):
    o_ref[...] = _mlp_logits(x_ref[...], w1[...], b1[...], w2[...], b2[...],
                             w3[...], b3[...], compute_dtype).astype(o_ref.dtype)


def _fused_kernel(x_ref, w1, b1, w2, b2, w3, b3, o_ref, *, pol_out, compute_dtype):
    """Fused policy+value heads: the wrapper pre-concatenates / block-diagonalizes the
    weights, so both heads are 3 wide dots. Policy columns get a masked softmax; value
    columns pass through. Output is one concatenated slab (single writeback stream)."""
    logits = _mlp_logits(x_ref[...], w1[...], b1[...], w2[...], b2[...],
                         w3[...], b3[...], compute_dtype)          # (TB, pol_out+val_out)
    col = jax.lax.broadcasted_iota(jnp.int32, logits.shape, dimension=1)
    is_pol = col < pol_out
    masked = jnp.where(is_pol, logits, -jnp.inf)
    m = jnp.max(masked, axis=-1, keepdims=True)                    # max over policy cols only
    e = jnp.exp(masked - m)                                        # exp(-inf)=0 on value cols
    probs = e / jnp.sum(e, axis=-1, keepdims=True)
    o_ref[...] = jnp.where(is_pol, probs, logits).astype(o_ref.dtype)


# ---------------------------------------------------------------------------
# Tiling helpers
# ---------------------------------------------------------------------------
def _clamp_block_rows(block_rows, n_cols_total):
    """Keep double-buffered x + output tiles well inside the v5e 16 MiB scoped-VMEM
    default (also safe against v7x's 64 MiB physical VMEM if callers scale up)."""
    budget = 12 << 20
    max_rows = budget // (2 * 4 * max(n_cols_total, 1))
    max_rows = max(8, (max_rows // 8) * 8)
    return min(block_rows, max_rows)


def _batch_tiling(B, block_rows, n_cores=2):
    """Pick (TB, Bp): minimal padding (<8 rows per step) and, when gridded, a step
    count that is a multiple of 2 for balanced v7x megacore sharding."""
    if B <= block_rows:
        return B, B                                   # one full-extent block, no padding
    n_steps = -(-B // block_rows)                     # cdiv
    if n_steps % n_cores:
        n_steps += n_cores - (n_steps % n_cores)
    TB = -(-B // n_steps)
    TB = -(-TB // 8) * 8                              # sublane (8) alignment
    return TB, n_steps * TB


def _full_spec(a):
    # Full-extent block with a constant index_map: stays VMEM-resident across the grid.
    # TODO(synk): pipeline_mode=pl.Buffered(1) would drop the unused second buffer;
    # skipped here (trivial at these sizes) to keep the compile path conservative.
    return pl.BlockSpec(a.shape, lambda i: (0,) * a.ndim)


def _launch(kernel, x, weights, out_width, block_rows):
    B, F = x.shape
    block_rows = _clamp_block_rows(block_rows, F + out_width)
    TB, Bp = _batch_tiling(B, block_rows)
    if Bp != B:
        x = jnp.pad(x, ((0, Bp - B), (0, 0)))
    in_specs = [pl.BlockSpec((TB, F), lambda i: (i, 0))] + [_full_spec(a) for a in weights]
    out = pl.pallas_call(
        kernel,
        out_shape=jax.ShapeDtypeStruct((Bp, out_width), jnp.float32),
        grid=(Bp // TB,),
        in_specs=in_specs,
        out_specs=pl.BlockSpec((TB, out_width), lambda i: (i, 0)),
        compiler_params=pltpu.CompilerParams(dimension_semantics=("parallel",)),
    )(x, *weights)
    return out[:B] if Bp != B else out


# ---------------------------------------------------------------------------
# Wrappers
# ---------------------------------------------------------------------------
def network_forward(x, params, is_policy=True, *, block_rows=4096, compute_dtype=None):
    """Pallas forward pass of `Network`.

    x: (B, input_size) float32
    params: dict with w1 (in,h0), b1 (1,h0), w2 (h0,h1), b2 (1,h1), w3 (h1,out), b3 (1,out)
    compute_dtype: optional MXU-input dtype (e.g. jnp.bfloat16); cast happens in-kernel,
                   accumulation / bias / ReLU / softmax stay f32.
    """
    kernel = functools.partial(
        _policy_kernel if is_policy else _value_kernel, compute_dtype=compute_dtype)
    weights = (params["w1"], params["b1"], params["w2"], params["b2"],
               params["w3"], params["b3"])
    return _launch(kernel, x, weights, params["w3"].shape[1], block_rows)


def fuse_actor_critic_params(policy_params, value_params):
    """Concatenate layer-1 weights and block-diagonalize layers 2/3 so both heads run
    as 3 wide dots. Do this once (e.g. under jit / at param-update time), not per step."""
    h0p, h1p = policy_params["w2"].shape
    h0v, h1v = value_params["w2"].shape
    outp = policy_params["w3"].shape[1]
    outv = value_params["w3"].shape[1]
    w1 = jnp.concatenate([policy_params["w1"], value_params["w1"]], axis=1)
    b1 = jnp.concatenate([policy_params["b1"], value_params["b1"]], axis=1)
    w2 = jnp.zeros((h0p + h0v, h1p + h1v), jnp.float32)
    w2 = w2.at[:h0p, :h1p].set(policy_params["w2"]).at[h0p:, h1p:].set(value_params["w2"])
    b2 = jnp.concatenate([policy_params["b2"], value_params["b2"]], axis=1)
    w3 = jnp.zeros((h1p + h1v, outp + outv), jnp.float32)
    w3 = w3.at[:h1p, :outp].set(policy_params["w3"]).at[h1p:, outp:].set(value_params["w3"])
    b3 = jnp.concatenate([policy_params["b3"], value_params["b3"]], axis=1)
    return (w1, b1, w2, b2, w3, b3), outp, outv


def actor_critic_forward(x, policy_params, value_params, *,
                         block_rows=4096, compute_dtype=None):
    """Fused policy + value forward: one pallas_call, one x DMA per tile, 3 dots per
    tile, one concatenated output slab (split here)."""
    fused_weights, pol_out, val_out = fuse_actor_critic_params(policy_params, value_params)
    kernel = functools.partial(_fused_kernel, pol_out=pol_out, compute_dtype=compute_dtype)
    out = _launch(kernel, x, fused_weights, pol_out + val_out, block_rows)
    return out[:, :pol_out], out[:, pol_out:]


# ---------------------------------------------------------------------------
# Init & reference
# ---------------------------------------------------------------------------
def init_params(key, input_size, output_size, hidden_sizes=(64, 64)):
    """Deterministic init, mimicking nn.Linear default (U[-1/sqrt(fan_in), +])."""
    sizes = [input_size, *hidden_sizes, output_size]
    params = {}
    for i in range(3):
        fan_in, fan_out = sizes[i], sizes[i + 1]
        key, kw, kb = jax.random.split(key, 3)
        bound = 1.0 / jnp.sqrt(fan_in)
        params[f"w{i+1}"] = jax.random.uniform(
            kw, (fan_in, fan_out), jnp.float32, -bound, bound)
        params[f"b{i+1}"] = jax.random.uniform(
            kb, (1, fan_out), jnp.float32, -bound, bound)
    return params


def _reference_forward(x, params, is_policy=True):
    h = jnp.maximum(x @ params["w1"] + params["b1"], 0.0)
    h = jnp.maximum(h @ params["w2"] + params["b2"], 0.0)
    logits = h @ params["w3"] + params["b3"]
    return jax.nn.softmax(logits, axis=-1) if is_policy else logits


# ---------------------------------------------------------------------------
# Self-test
# ---------------------------------------------------------------------------
if __name__ == "__main__":
    key = jax.random.PRNGKey(0)
    batch, input_size, n_actions = 8, 16, 4
    hidden_sizes = (32, 32)

    key, kx, kp, kv, kb = jax.random.split(key, 5)
    x_small = jax.random.normal(kx, (batch, input_size), jnp.float32)
    pol_params = init_params(kp, input_size, n_actions, hidden_sizes)
    val_params = init_params(kv, input_size, 1, hidden_sizes)

    # 1) Small batch, policy head (Network(is_policy=True)).
    probs = jax.block_until_ready(network_forward(x_small, pol_params, is_policy=True))
    assert probs.shape == (batch, n_actions)
    assert jnp.allclose(probs, _reference_forward(x_small, pol_params, True),
                        atol=1e-4, rtol=1e-4)
    assert jnp.allclose(jnp.sum(probs, axis=-1), jnp.ones((batch,)), atol=1e-5)

    # 2) Small batch, value head (Network(is_policy=False)).
    vals = jax.block_until_ready(network_forward(x_small, val_params, is_policy=False))
    assert jnp.allclose(vals, _reference_forward(x_small, val_params, False),
                        atol=1e-4, rtol=1e-4)

    # 3) Large batch, fused policy+value heads (single full-extent tile, no padding).
    big_b = 1030
    x_big = jax.random.normal(kb, (big_b, input_size), jnp.float32)
    p_big, v_big = actor_critic_forward(x_big, pol_params, val_params)
    jax.block_until_ready((p_big, v_big))
    assert p_big.shape == (big_b, n_actions) and v_big.shape == (big_b, 1)
    assert jnp.allclose(p_big, _reference_forward(x_big, pol_params, True),
                        atol=1e-4, rtol=1e-4)
    assert jnp.allclose(v_big, _reference_forward(x_big, val_params, False),
                        atol=1e-4, rtol=1e-4)

    # 4) Multi-step grid + minimal (<8 rows/step) padding path, even step count.
    p_g, v_g = actor_critic_forward(x_big, pol_params, val_params, block_rows=256)
    jax.block_until_ready((p_g, v_g))
    assert jnp.allclose(p_g, p_big, atol=1e-5, rtol=1e-5)
    assert jnp.allclose(v_g, v_big, atol=1e-5, rtol=1e-5)

    # 5) bf16 MXU-input path (v6e/v7x): in-kernel cast, f32 accumulation & softmax.
    #    Accuracy is documented as looser for the value head under bf16.
    p_bf16 = jax.block_until_ready(
        network_forward(x_big, pol_params, is_policy=True, compute_dtype=jnp.bfloat16))
    assert bool(jnp.all(jnp.isfinite(p_bf16)))
    assert jnp.allclose(jnp.sum(p_bf16, axis=-1), jnp.ones((big_b,)), atol=1e-3)

    print("KERNEL_OK")
</pallas_src>

<mosaic_0001>
module attributes {stable_mosaic.version = 11 : i64} {
  func.func @_policy_kernel(%arg0: i32, %arg1: memref<8x16xf32, #tpu.memory_space<vmem>>, %arg2: memref<16x32xf32, #tpu.memory_space<vmem>>, %arg3: memref<1x32xf32, #tpu.memory_space<vmem>>, %arg4: memref<32x32xf32, #tpu.memory_space<vmem>>, %arg5: memref<1x32xf32, #tpu.memory_space<vmem>>, %arg6: memref<32x4xf32, #tpu.memory_space<vmem>>, %arg7: memref<1x4xf32, #tpu.memory_space<vmem>>, %arg8: memref<8x4xf32, #tpu.memory_space<vmem>>) attributes {dimension_semantics = [#tpu.dimension_semantics<parallel>], iteration_bounds = array<i64: 1>, scalar_prefetch = 0 : i64, scratch_operands = 0 : i64, tpu.core_type = #tpu.core_type<tc>, window_params = [{transform_indices = @transform_0, window_bounds = array<i64: 8, 16>}, {pipeline_mode = #tpu.pipeline_mode<synchronous>, transform_indices = @transform_1, window_bounds = array<i64: 16, 32>}, {pipeline_mode = #tpu.pipeline_mode<synchronous>, transform_indices = @transform_2, window_bounds = array<i64: 1, 32>}, {pipeline_mode = #tpu.pipeline_mode<synchronous>, transform_indices = @transform_3, window_bounds = array<i64: 32, 32>}, {pipeline_mode = #tpu.pipeline_mode<synchronous>, transform_indices = @transform_4, window_bounds = array<i64: 1, 32>}, {pipeline_mode = #tpu.pipeline_mode<synchronous>, transform_indices = @transform_5, window_bounds = array<i64: 32, 4>}, {pipeline_mode = #tpu.pipeline_mode<synchronous>, transform_indices = @transform_6, window_bounds = array<i64: 1, 4>}, {transform_indices = @transform_7, window_bounds = array<i64: 8, 4>}]} {
    %c0 = arith.constant 0 : index
    %c0_0 = arith.constant 0 : index
    %0 = vector.load %arg1[%c0, %c0_0] : memref<8x16xf32, #tpu.memory_space<vmem>>, vector<8x16xf32>
    %c0_1 = arith.constant 0 : index
    %c0_2 = arith.constant 0 : index
    %1 = vector.load %arg2[%c0_1, %c0_2] : memref<16x32xf32, #tpu.memory_space<vmem>>, vector<16x32xf32>
    %c0_3 = arith.constant 0 : index
    %c0_4 = arith.constant 0 : index
    %2 = vector.load %arg3[%c0_3, %c0_4] : memref<1x32xf32, #tpu.memory_space<vmem>>, vector<1x32xf32>
    %c0_5 = arith.constant 0 : index
    %c0_6 = arith.constant 0 : index
    %3 = vector.load %arg4[%c0_5, %c0_6] : memref<32x32xf32, #tpu.memory_space<vmem>>, vector<32x32xf32>
    %c0_7 = arith.constant 0 : index
    %c0_8 = arith.constant 0 : index
    %4 = vector.load %arg5[%c0_7, %c0_8] : memref<1x32xf32, #tpu.memory_space<vmem>>, vector<1x32xf32>
    %c0_9 = arith.constant 0 : index
    %c0_10 = arith.constant 0 : index
    %5 = vector.load %arg6[%c0_9, %c0_10] : memref<32x4xf32, #tpu.memory_space<vmem>>, vector<32x4xf32>
    %c0_11 = arith.constant 0 : index
    %c0_12 = arith.constant 0 : index
    %6 = vector.load %arg7[%c0_11, %c0_12] : memref<1x4xf32, #tpu.memory_space<vmem>>, vector<1x4xf32>
    %cst = arith.constant dense<0.000000e+00> : vector<8x32xf32>
    %7 = tpu.matmul %0, %1, %cst {dimension_numbers = #tpu.dot_dimension_numbers<[1], [0], [0], [1], [0, 0, 1, 1], [], []>} : vector<8x16xf32>, vector<16x32xf32>, vector<8x32xf32> -> vector<8x32xf32>
    %8 = vector.broadcast %2 : vector<1x32xf32> to vector<8x32xf32>
    %9 = arith.addf %7, %8 : vector<8x32xf32>
    %cst_13 = arith.constant 0.000000e+00 : f32
    %10 = vector.broadcast %cst_13 : f32 to vector<8x32xf32>
    %11 = arith.maximumf %9, %10 : vector<8x32xf32>
    %cst_14 = arith.constant dense<0.000000e+00> : vector<8x32xf32>
    %12 = tpu.matmul %11, %3, %cst_14 {dimension_numbers = #tpu.dot_dimension_numbers<[1], [0], [0], [1], [0, 0, 1, 1], [], []>} : vector<8x32xf32>, vector<32x32xf32>, vector<8x32xf32> -> vector<8x32xf32>
    %13 = vector.broadcast %4 : vector<1x32xf32> to vector<8x32xf32>
    %14 = arith.addf %12, %13 : vector<8x32xf32>
    %cst_15 = arith.constant 0.000000e+00 : f32
    %15 = vector.broadcast %cst_15 : f32 to vector<8x32xf32>
    %16 = arith.maximumf %14, %15 : vector<8x32xf32>
    %cst_16 = arith.constant dense<0.000000e+00> : vector<8x4xf32>
    %17 = tpu.matmul %16, %5, %cst_16 {dimension_numbers = #tpu.dot_dimension_numbers<[1], [0], [0], [1], [0, 0, 1, 1], [], []>} : vector<8x32xf32>, vector<32x4xf32>, vector<8x4xf32> -> vector<8x4xf32>
    %18 = vector.broadcast %6 : vector<1x4xf32> to vector<8x4xf32>
    %19 = arith.addf %17, %18 : vector<8x4xf32>
    %cst_17 = arith.constant dense<0xFF800000> : vector<8xf32>
    %20 = vector.multi_reduction <maximumf>, %19, %cst_17 [1] : vector<8x4xf32> to vector<8xf32>
    %21 = vector.shape_cast %20 : vector<8xf32> to vector<8x1xf32>
    %22 = vector.broadcast %21 : vector<8x1xf32> to vector<8x4xf32>
    %23 = arith.subf %19, %22 : vector<8x4xf32>
    %24 = math.exp %23 : vector<8x4xf32>
    %cst_18 = arith.constant dense<0.000000e+00> : vector<8xf32>
    %25 = vector.multi_reduction <add>, %24, %cst_18 [1] : vector<8x4xf32> to vector<8xf32>
    %26 = vector.shape_cast %25 : vector<8xf32> to vector<8x1xf32>
    %27 = vector.broadcast %26 : vector<8x1xf32> to vector<8x4xf32>
    %28 = arith.divf %24, %27 : vector<8x4xf32>
    %c0_19 = arith.constant 0 : index
    %c0_20 = arith.constant 0 : index
    %29 = vector.load %arg8[%c0_19, %c0_20] : memref<8x4xf32, #tpu.memory_space<vmem>>, vector<8x4xf32>
    tpu.vector_store %arg8[%c0_19, %c0_20], %28 {strides = array<i32>} : memref<8x4xf32, #tpu.memory_space<vmem>>, vector<8x4xf32>,
    return
  }
  func.func @transform_0(%arg0: i32) -> (i32, i32) {
    %c0_i32 = arith.constant 0 : i32
    %c0_i32_0 = arith.constant 0 : i32
    return %arg0, %c0_i32 : i32, i32
  }
  func.func @transform_1(%arg0: i32) -> (i32, i32) {
    %c0_i32 = arith.constant 0 : i32
    %c0_i32_0 = arith.constant 0 : i32
    %c0_i32_1 = arith.constant 0 : i32
    return %c0_i32, %c0_i32_0 : i32, i32
  }
  func.func @transform_2(%arg0: i32) -> (i32, i32) {
    %c0_i32 = arith.constant 0 : i32
    %c0_i32_0 = arith.constant 0 : i32
    %c0_i32_1 = arith.constant 0 : i32
    return %c0_i32, %c0_i32_0 : i32, i32
  }
  func.func @transform_3(%arg0: i32) -> (i32, i32) {
    %c0_i32 = arith.constant 0 : i32
    %c0_i32_0 = arith.constant 0 : i32
    %c0_i32_1 = arith.constant 0 : i32
    return %c0_i32, %c0_i32_0 : i32, i32
  }
  func.func @transform_4(%arg0: i32) -> (i32, i32) {
    %c0_i32 = arith.constant 0 : i32
    %c0_i32_0 = arith.constant 0 : i32
    %c0_i32_1 = arith.constant 0 : i32
    return %c0_i32, %c0_i32_0 : i32, i32
  }
  func.func @transform_5(%arg0: i32) -> (i32, i32) {
    %c0_i32 = arith.constant 0 : i32
    %c0_i32_0 = arith.constant 0 : i32
    %c0_i32_1 = arith.constant 0 : i32
    return %c0_i32, %c0_i32_0 : i32, i32
  }
  func.func @transform_6(%arg0: i32) -> (i32, i32) {
    %c0_i32 = arith.constant 0 : i32
    %c0_i32_0 = arith.constant 0 : i32
    %c0_i32_1 = arith.constant 0 : i32
    return %c0_i32, %c0_i32_0 : i32, i32
  }
  func.func @transform_7(%arg0: i32) -> (i32, i32) {
    %c0_i32 = arith.constant 0 : i32
    %c0_i32_0 = arith.constant 0 : i32
    return %arg0, %c0_i32 : i32, i32
  }
}

</mosaic_0001>

<bundles_post_ra>
// kernel: tpu_custom_call.1
= control target key start
LH: loop header
LB: loop body
LE: loop exit
PB: predicated region body
PF: predicated region fallthrough
CT: control target
= control target key end

     0   :  { %12 = vsyncpa [#allocation3], 0  ;;  %s410_s24 = smov [#allocation2]   ;;  %s513_s0 = inlined_call_operand.vmem [shape: f32[8,16], index: 0, kind: input, shape index: {}]   ;;  %s514_s1 = inlined_call_operand.hbm [shape: f32[16,32], index: 1, kind: input, shape index: {}]   ;;  %s515_s2 = inlined_call_operand.vmem [shape: f32[1,32], index: 2, kind: input, shape index: {}]   ;;  %s516_s3 = inlined_call_operand.vmem [shape: f32[32,32], index: 3, kind: input, shape index: {}]   ;;  %s517_s4 = inlined_call_operand.vmem [shape: f32[1,32], index: 4, kind: input, shape index: {}]   ;;  %s518_s5 = inlined_call_operand.vmem [shape: f32[32,4], index: 5, kind: input, shape index: {}]   ;;  %s519_s6 = inlined_call_operand.vmem [shape: f32[1,4], index: 6, kind: input, shape index: {}]   ;;  %s520_s7 = inlined_call_operand.vmem [shape: f32[8,4], index: 7, kind: output, shape index: {}]  }
   0x1   :  { %s20_s25 = sshll.u32 %s410_s24, 4  ;;  %s386_s28 = scalar_lea.hbm %s514_s1, 256  ;;  %s21_s25 = int_to_ptr.vmem [resolvable:$true] %s20_s25 }
   0x2   :  { %p387_p0 = scmp.ne.s32.totalorder %s514_s1, %s386_s28  ;;  %p390_p1 = scmp.lt.u32.totalorder %s386_s28, %s514_s1 }
   0x4   :  { %p392_p2 = pnand %p390_p1, %p387_p0 }
   0x6   :  { %395 = shalt.err (!%p392_p2)
}
   0x7   :  { %s396_s10 = scalar_lea.vmem %s21_s25, 256  ;;  %p401_p4 = scmp.lt.s32.totalorder %s21_s25, %s21_s25 }
   0x8   :  { %p397_p3 = scmp.ne.s32.totalorder %s21_s25, %s396_s10  ;;  %p402_p5 = scmp.lt.s32.totalorder %s396_s10, %s396_s10 }
   0xa   :  { %p403_p6 = por %p402_p5, %p401_p4 }
   0xc   :  { %p404_p7 = pnand %p403_p6, %p397_p3 }
   0xe   :  { %407 = shalt.err (!%p404_p7)
}
   0xf   :  { %s411_s11 = smov 128   ;;  %s412_s12 = smov 8  }
  0x10   :  { %26 = dma.hbm_to_vmem [thread:$0]  %s514_s1, 256, %s21_s25, [#allocation3], %s411_s11, %s411_s11, %s412_s12  }
  0x11   :  { %408 = dma.done.wait [#allocation3], 256  }
  0x12   :  { %409 = vsyncadd [#allocation3], 4294967040  ;;  %v413_v0 = vmov 0.0|0.0   ;;  %vm414_vm0 = vmmov 0   ;;  %v415_v1 = vmov 0.0   ;;  %v41_v2 = vld [vmem:[#allocation2] sm:$0xff] }
  0x13   :  { %361 = vmatprep.subr.bf16.mxu0 %v413_v0  ;;  %336 = vmatprep.mubr.msk.f32.mxu0 %vm414_vm0, %v415_v1  ;;  %v42_v3 = vld [vmem:[#allocation2 + $0x8] sm:$0xff]  ;;  %v44_v5 = vld [vmem:[%s516_s3] sm:$0xff]  ;;  %vm60_vm1 = vcmask 130048   ;;  %v46_v9 = vld [vmem:[%s516_s3 + $0x10] sm:$0xff]  ;;  %vm141_vm2 = vcmask 261120   ;;  %vm295_vm3 = vcmask 31744  }
  0x14   :  { %364 = vmatprep.subr.bf16.mxu1 %v413_v0  ;;  %347 = vmatprep.mubr.msk.f32.mxu1 %vm414_vm0, %v415_v1  ;;  %v362_v4 = vpack.c.bf16 %v42_v3, %v41_v2  ;;  %v45_v6 = vld [vmem:[%s516_s3 + $0x8] sm:$0xff]  ;;  %v40_v8 = vld [vmem:[%s513_s0] sm:$0xff]  ;;  %v47_v10 = vld [vmem:[%s516_s3 + $0x18] sm:$0xff] }
  0x15   :  { %v365_v7 = vpack.c.bf16 %v45_v6, %v44_v5  ;;  %v368_v11 = vpack.c.bf16 %v47_v10, %v46_v9  ;;  %v49_v12 = vld [vmem:[%s518_s5] sm:$0xff]  ;;  %v50_v13 = vld [vmem:[%s518_s5 + $0x8] sm:$0xff]  ;;  %v51_v20 = vld [vmem:[%s518_s5 + $0x10] sm:$0xff] }
  0x16   :  { %363 = vmatpush3.bf16.msra.mxu0 %v362_v4  ;;  %v371_v14 = vpack.c.bf16 %v50_v13, %v49_v12  ;;  %v313_v15 = vld [vmem:[%s515_s2] ss:$0 sm:$0xff]  ;;  %v52_v21 = vld [vmem:[%s518_s5 + $0x18] sm:$0xff] }
  0x17   :  { %366 = vmatpush3.bf16.msra.mxu1 %v365_v7  ;;  %370 = vmatprep.subr.bf16.mxu0 %v413_v0  ;;  %v374_v22 = vpack.c.bf16 %v52_v21, %v51_v20  ;;  %v315_v23 = vld [vmem:[%s517_s4] ss:$0 sm:$0xff] }
  0x18   :  { %367 = vmatprep.subr.bf16.mxu1 %v413_v0  ;;  %v317_v28 = vld [vmem:[%s519_s6] ss:$0 sm:$0xff] }
  0x19   :  { %337 = vmatmul.mubr.msk.f32.vlgmr.msra.gmra.mrb[0].mxu0 %vm60_vm1, %v40_v8 }
  0x1a   :  { %358 = vmatprep.mubr.msk.f32.mxu0 %vm414_vm0, %v415_v1  ;;  %372 = vmatpush3.bf16.msra.mxu0 %v371_v14 }
  0x1b   :  { %369 = vmatpush3.bf16.msra.mxu1 %v368_v11  ;;  %373 = vmatprep.subr.bf16.mxu0 %v413_v0 }
  0x1e   :  { %375 = vmatpush3.bf16.msra.mxu0 %v374_v22 }
  0xec   :  { %v130_v16 = vpop.f32.mrb[0].mxu0 }
  0xed   :  { %v131_v17 = vadd.f32 %v313_v15, %v130_v16  ;;  %v338_v18 = vpop.f32.mrb[1].mxu0 }
  0xef   :  { %v134_v19 = vmax.f32 %v131_v17, 0.0 }
  0xf1   :  { %348 = vmatmul.mubr.msk.f32.vlgmr.msra.gmra.mrb[0].mxu1 %vm141_vm2, %v134_v19 }
 0x1c4   :  { %v211_v24 = vpop.f32.mrb[0].mxu1 }
 0x1c5   :  { %v212_v25 = vadd.f32 %v315_v23, %v211_v24  ;;  %v349_v26 = vpop.f32.mrb[1].mxu1 }
 0x1c7   :  { %v215_v27 = vmax.f32 %v212_v25, 0.0 }
 0x1c9   :  { %359 = vmatmul.mubr.msk.f32.vlgmr.msra.gmra.mrb[2].mxu0 %vm141_vm2, %v215_v27 }
 0x29c   :  { %v291_v29 = vpop.f32.mrb[2].mxu0 }
 0x29d   :  { %v292_v30 = vadd.f32 %v317_v28, %v291_v29  ;;  %v360_v31 = vpop.f32.mrb[3].mxu0 }
 0x29f   :  { %v296_v32 = vsel %vm295_vm3, %v292_v30, -inf }
 0x2a0   :  { %297 = vmax.xlane.f32.xlu0 %v296_v32 }
 0x32d   :  { %v298_v33 = vpop.xlane.xlu0 %297 }
 0x32e   :  { %v299_v34 = vsub.f32 %v292_v30, %v298_v33 }
 0x330   :  { %v300_v35 = vmul.f32 1.442695, %v299_v34 }
 0x332   :  { %382 = vpow2.f32 %v300_v35 }
 0x33c   :  { %v383_v36 = vpop.eup %382 }
 0x33d   :  { %v302_v37 = vsel %vm295_vm3, %v383_v36, 0.0 }
 0x33e   :  { %303 = vadd.xlane.f32.xlu0 %v302_v37 }
 0x3cb   :  { %v304_v38 = vpop.xlane.xlu0 %303 }
 0x3cc   :  { %384 = vrcp.f32 %v304_v38 }
 0x3d6   :  { %v385_v39 = vpop.eup %384 }
 0x3d7   :  { %v306_v40 = vmul.f32 %v385_v39, %v383_v36 }
 0x3d9   :  { %307 = vst.msk [vmem:[%s520_s7] sm:$0xff] %vm295_vm3, %v306_v40 }
 0x3da   :  { %312 = vsyncpa [#allocation3], 1 }

</bundles_post_ra>
